<compile_context>
chip_gen: v7x
topology: tpu7x:2x2x1
jax: 0.10.0
libtpu: 0.0.40
codegen_flags: <defaults>
</compile_context>

<pallas_src>
import functools

import jax
import jax.numpy as jnp
from jax.experimental import pallas as pl
from jax.experimental.pallas import tpu as pltpu


_F32_BIG = 1e30  # finite cap on the sigmoid denominator (keeps the Newton step NaN-free)


def _yolo_decode_kernel(off_ref, sscale_ref, x_ref, io_ref):
    """Elementwise YOLO decode on a lane-dense, channel-minor interleaved block.

    off_ref:    (1, 1, T)  f32  additive offset (grid_x*stride / grid_y*stride at the
                                x/y positions of the interleaved layout, 0 elsewhere)
    sscale_ref: (1, na, T) f32  signed scale: +stride (xy), -anchor_w/-anchor_h (wh;
                                the sign tags the exp() channels), +1 (obj/cls)
    x_ref:      (gb, na, T)     raw predictions (channel-minor interleaved)
    io_ref:     (gb, na, T)     decoded boxes/scores, same layout
    """
    x = x_ref[...].astype(jnp.float32)
    ss = sscale_ref[...]                       # broadcasts over the gb axis
    off = off_ref[...]                         # broadcasts over gb and na axes

    is_exp = ss < 0.0                          # w/h channels (anchors are > 0)
    mag = jnp.abs(ss)

    # One transcendental per element: e = exp(x) on w/h channels, exp(-x) elsewhere;
    # sigmoid(x) = 1/(1+exp(-x)) via the EUP approx reciprocal + one Newton step
    # (back to ~f32 accuracy; denominator capped so inf never meets a zero).
    e = jnp.exp(jnp.where(is_exp, x, -x))
    d = jnp.minimum(1.0 + e, _F32_BIG)
    r = pl.reciprocal(d, approx=True)
    r = r * (2.0 - d * r)                      # Newton refinement
    t = jnp.where(is_exp, e, r)

    io_ref[...] = (t * mag + off).astype(io_ref.dtype)


def _pick_tile(flat, target=8192):
    """Largest lane-dense tile (multiple of 128) dividing the interleaved hw*no axis."""
    if flat <= target:
        return flat
    for t in range(target - (target % 128), 127, -128):
        if flat % t == 0:
            return t
    # TODO(synk): no 128-multiple divisor -> fall back to the full (untiled) axis;
    # ragged edge tiles would need masked writes.
    return flat


def _pick_group(bs, na, n_j, tile, itemsize, budget):
    """Batch rows fused per grid step, double-buffered VMEM held under `budget`."""
    na_pad = -(-na // 8) * 8                   # second-minor dim is sublane-padded to 8

    def vmem_bytes(g):
        in_blk = 2 * g * na_pad * tile * itemsize     # double-buffered input block
        out_blk = 2 * g * na_pad * tile * itemsize    # double-buffered output block
        aux_blk = 2 * (8 + na_pad) * tile * 4         # off + signed-scale blocks
        return in_blk + out_blk + aux_blk

    best = 1
    for g in range(1, bs + 1):
        if bs % g:
            continue
        if vmem_bytes(g) > budget:
            break
        if g > 1 and (bs // g) * n_j < 2:
            break          # keep >=2 grid steps so a v7x megacore can split the work
        best = g
    return best


@functools.partial(jax.jit, static_argnames=("stride",))
def yolo_layer_forward(p, anchors, stride):
    """Inference forward of YOLOLayer.

    Args:
      p:       (bs, na*no, ny, nx) NCHW predictions (f32 or bf16).
      anchors: (na, 2) anchor sizes in pixels.
      stride:  python int, layer stride.

    Returns:
      io: (bs, na*ny*nx, no) decoded boxes/scores
      pp: (bs, na, ny, nx, no) raw permuted predictions
    """
    bs, c, ny, nx = p.shape
    na = int(anchors.shape[0])
    no = c // na
    hw = ny * nx
    flat = hw * no
    dtype = p.dtype
    itemsize = jnp.dtype(dtype).itemsize

    # --- layout plumbing (one physical XLA transpose to channel-minor) -------
    # (bs, na*no, ny, nx) -> (bs, na, no, hw) -> (bs, na, hw, no) -> (bs, na, hw*no)
    x_t = p.reshape(bs, na, no, hw).transpose(0, 1, 3, 2).reshape(bs, na, flat)
    # The permuted raw output `pp` IS this slab (free metadata reshape), so the
    # kernel writes only the decoded slab -- no duplicated HBM traffic for `p`.
    pp = x_t.reshape(bs, na, ny, nx, no)

    # --- tiny host-side decode tables (channel-minor interleaved) ------------
    anchors = jnp.asarray(anchors, jnp.float32)
    stride_f = float(stride)
    j = jnp.arange(hw, dtype=jnp.int32)
    gx = (j % nx).astype(jnp.float32) * stride_f
    gy = (j // nx).astype(jnp.float32) * stride_f
    off = jnp.zeros((hw, no), jnp.float32).at[:, 0].set(gx).at[:, 1].set(gy)
    off = off.reshape(1, 1, flat)

    ss = jnp.ones((na, no), jnp.float32)
    ss = ss.at[:, 0:2].set(stride_f)
    # anchor_wh * stride == anchors; the negative sign tags the exp() channels.
    ss = ss.at[:, 2].set(-anchors[:, 0])
    ss = ss.at[:, 3].set(-anchors[:, 1])
    sscale = jnp.broadcast_to(ss[:, None, :], (na, hw, no)).reshape(1, na, flat)

    # --- generation-aware tiling ----------------------------------------------
    try:
        cap = int(getattr(pltpu.get_tpu_info(), "vmem_capacity_bytes", 0)) or (64 << 20)
    except Exception:  # pragma: no cover - conservative fallback (assume v7x)
        cap = 64 << 20
    budget = min(cap // 3, 48 << 20)           # ~21 MiB on v7x, ~43 MiB on v5e/v6e
    vmem_limit = int(min(cap * 3 // 4, 112 << 20))

    tile = _pick_tile(flat)
    n_j = flat // tile
    gb = _pick_group(bs, na, n_j, tile, itemsize, budget)
    # hw-tile axis outermost so the constant-index aux blocks are rarely re-DMA'd.
    grid = (n_j, bs // gb)

    n_el = bs * na * flat
    cost = pl.CostEstimate(
        flops=8 * n_el,
        transcendentals=n_el,
        bytes_accessed=2 * n_el * itemsize + (na + 1) * flat * 4)

    io_flat = pl.pallas_call(
        _yolo_decode_kernel,
        out_shape=jax.ShapeDtypeStruct((bs, na, flat), dtype),
        grid=grid,
        in_specs=[
            pl.BlockSpec((1, 1, tile), lambda j, i: (0, 0, j)),     # offsets
            pl.BlockSpec((1, na, tile), lambda j, i: (0, 0, j)),    # signed scales
            pl.BlockSpec((gb, na, tile), lambda j, i: (i, 0, j)),   # raw predictions
        ],
        out_specs=pl.BlockSpec((gb, na, tile), lambda j, i: (i, 0, j)),
        compiler_params=pltpu.CompilerParams(
            dimension_semantics=("parallel", "parallel"),
            vmem_limit_bytes=vmem_limit),
        cost_estimate=cost,
    )(off, sscale, x_t)

    io = io_flat.reshape(bs, na * hw, no)      # free metadata reshape
    # TODO(synk): training branch returns only `pp`; ASFF / ONNX_EXPORT branches are dead code here.
    return io, pp


def _reference_forward(p, anchors, stride):
    # Pure-JAX mirror of the PyTorch inference branch (for verification).
    bs, c, ny, nx = p.shape
    na = anchors.shape[0]
    no = c // na
    pp = p.reshape(bs, na, no, ny, nx).transpose(0, 1, 3, 4, 2)
    yv, xv = jnp.meshgrid(jnp.arange(ny), jnp.arange(nx), indexing="ij")
    grid = jnp.stack((xv, yv), 2).reshape(1, 1, ny, nx, 2).astype(jnp.float32)
    anchor_wh = (anchors / stride).reshape(1, na, 1, 1, 2).astype(jnp.float32)
    xy = (jax.nn.sigmoid(pp[..., :2]) + grid) * stride
    wh = (jnp.exp(pp[..., 2:4]) * anchor_wh) * stride
    rest = jax.nn.sigmoid(pp[..., 4:])
    io = jnp.concatenate([xy, wh, rest], axis=-1)
    return io.reshape(bs, -1, no), pp


if __name__ == "__main__":
    # Small deterministic config: nc=3 -> no=8, na=3 anchors, stride=8, 16x16 feature map.
    nc = 3
    no = nc + 5
    anchors = jnp.array([[10.0, 13.0], [16.0, 30.0], [33.0, 23.0]], dtype=jnp.float32)
    na = anchors.shape[0]
    stride = 8
    bs, ny, nx = 2, 16, 16

    key = jax.random.PRNGKey(0)
    x = jax.random.normal(key, (bs, na * no, ny, nx), dtype=jnp.float32)

    io, pp = yolo_layer_forward(x, anchors, stride=stride)
    io = jax.block_until_ready(io)
    pp = jax.block_until_ready(pp)

    io_ref, pp_ref = _reference_forward(x, anchors, stride)
    assert io.shape == (bs, na * ny * nx, no)
    assert pp.shape == (bs, na, ny, nx, no)
    assert jnp.allclose(pp, pp_ref, rtol=1e-6, atol=1e-6)
    assert jnp.allclose(io, io_ref, rtol=1e-4, atol=1e-4)

    print("KERNEL_OK")
</pallas_src>

<mosaic_0001>
module attributes {stable_mosaic.version = 11 : i64} {
  func.func @_yolo_decode_kernel(%arg0: i32, %arg1: i32, %arg2: memref<1x1x2048xf32, #tpu.memory_space<vmem>>, %arg3: memref<1x3x2048xf32, #tpu.memory_space<vmem>>, %arg4: memref<1x3x2048xf32, #tpu.memory_space<vmem>>, %arg5: memref<1x3x2048xf32, #tpu.memory_space<vmem>>) attributes {dimension_semantics = [#tpu.dimension_semantics<parallel>, #tpu.dimension_semantics<parallel>], iteration_bounds = array<i64: 1, 2>, scalar_prefetch = 0 : i64, scratch_operands = 0 : i64, tpu.core_type = #tpu.core_type<tc>, window_params = [{transform_indices = @transform_0, window_bounds = array<i64: 1, 1, 2048>}, {transform_indices = @transform_1, window_bounds = array<i64: 1, 3, 2048>}, {transform_indices = @transform_2, window_bounds = array<i64: 1, 3, 2048>}, {transform_indices = @transform_3, window_bounds = array<i64: 1, 3, 2048>}]} {
    %c0 = arith.constant 0 : index
    %c0_0 = arith.constant 0 : index
    %c0_1 = arith.constant 0 : index
    %0 = vector.load %arg4[%c0, %c0_0, %c0_1] : memref<1x3x2048xf32, #tpu.memory_space<vmem>>, vector<1x3x2048xf32>
    %c0_2 = arith.constant 0 : index
    %c0_3 = arith.constant 0 : index
    %c0_4 = arith.constant 0 : index
    %1 = vector.load %arg3[%c0_2, %c0_3, %c0_4] : memref<1x3x2048xf32, #tpu.memory_space<vmem>>, vector<1x3x2048xf32>
    %c0_5 = arith.constant 0 : index
    %c0_6 = arith.constant 0 : index
    %c0_7 = arith.constant 0 : index
    %2 = vector.load %arg2[%c0_5, %c0_6, %c0_7] : memref<1x1x2048xf32, #tpu.memory_space<vmem>>, vector<1x1x2048xf32>
    %cst = arith.constant 0.000000e+00 : f32
    %3 = vector.broadcast %cst : f32 to vector<1x3x2048xf32>
    %4 = arith.cmpf olt, %1, %3 : vector<1x3x2048xf32>
    %5 = math.absf %1 : vector<1x3x2048xf32>
    %cst_8 = arith.constant 0.000000e+00 : f32
    %6 = vector.broadcast %cst_8 : f32 to vector<1x3x2048xf32>
    %7 = arith.subf %6, %0 : vector<1x3x2048xf32>
    %8 = arith.select %4, %0, %7 : vector<1x3x2048xi1>, vector<1x3x2048xf32>
    %9 = math.exp %8 : vector<1x3x2048xf32>
    %cst_9 = arith.constant 1.000000e+00 : f32
    %10 = vector.broadcast %cst_9 : f32 to vector<1x3x2048xf32>
    %11 = arith.addf %10, %9 : vector<1x3x2048xf32>
    %cst_10 = arith.constant 1.000000e+30 : f32
    %12 = vector.broadcast %cst_10 : f32 to vector<1x3x2048xf32>
    %13 = arith.minimumf %11, %12 : vector<1x3x2048xf32>
    %14 = tpu.reciprocal %13 {approx = true} : vector<1x3x2048xf32> -> vector<1x3x2048xf32>
    %15 = arith.mulf %13, %14 : vector<1x3x2048xf32>
    %cst_11 = arith.constant 2.000000e+00 : f32
    %16 = vector.broadcast %cst_11 : f32 to vector<1x3x2048xf32>
    %17 = arith.subf %16, %15 : vector<1x3x2048xf32>
    %18 = arith.mulf %14, %17 : vector<1x3x2048xf32>
    %19 = arith.select %4, %9, %18 : vector<1x3x2048xi1>, vector<1x3x2048xf32>
    %20 = arith.mulf %19, %5 : vector<1x3x2048xf32>
    %21 = vector.broadcast %2 : vector<1x1x2048xf32> to vector<1x3x2048xf32>
    %22 = arith.addf %20, %21 : vector<1x3x2048xf32>
    %c0_12 = arith.constant 0 : index
    %c0_13 = arith.constant 0 : index
    %c0_14 = arith.constant 0 : index
    %23 = vector.load %arg5[%c0_12, %c0_13, %c0_14] : memref<1x3x2048xf32, #tpu.memory_space<vmem>>, vector<1x3x2048xf32>
    tpu.vector_store %arg5[%c0_12, %c0_13, %c0_14], %22 {strides = array<i32>} : memref<1x3x2048xf32, #tpu.memory_space<vmem>>, vector<1x3x2048xf32>,
    return
  }
  func.func @transform_0(%arg0: i32, %arg1: i32) -> (i32, i32, i32) {
    %c0_i32 = arith.constant 0 : i32
    %c0_i32_0 = arith.constant 0 : i32
    %c0_i32_1 = arith.constant 0 : i32
    return %c0_i32, %c0_i32_0, %arg0 : i32, i32, i32
  }
  func.func @transform_1(%arg0: i32, %arg1: i32) -> (i32, i32, i32) {
    %c0_i32 = arith.constant 0 : i32
    %c0_i32_0 = arith.constant 0 : i32
    %c0_i32_1 = arith.constant 0 : i32
    return %c0_i32, %c0_i32_0, %arg0 : i32, i32, i32
  }
  func.func @transform_2(%arg0: i32, %arg1: i32) -> (i32, i32, i32) {
    %c0_i32 = arith.constant 0 : i32
    %c0_i32_0 = arith.constant 0 : i32
    return %arg1, %c0_i32, %arg0 : i32, i32, i32
  }
  func.func @transform_3(%arg0: i32, %arg1: i32) -> (i32, i32, i32) {
    %c0_i32 = arith.constant 0 : i32
    %c0_i32_0 = arith.constant 0 : i32
    return %arg1, %c0_i32, %arg0 : i32, i32, i32
  }
}

</mosaic_0001>

<bundles_post_ra>
// kernel: yolo_layer_forward.1
= control target key start
LH: loop header
LB: loop body
LE: loop exit
PB: predicated region body
PF: predicated region fallthrough
CT: control target
= control target key end

     0   :  { %s708_s12 = smov 0   ;;  %s710_s13 = smov 0   ;;  %s951_s0 = inlined_call_operand.vmem [shape: f32[1,1,2048], index: 0, kind: input, shape index: {}]   ;;  %s952_s1 = inlined_call_operand.vmem [shape: f32[1,3,2048], index: 1, kind: input, shape index: {}]   ;;  %s953_s2 = inlined_call_operand.vmem [shape: f32[2,3,2048], index: 2, kind: input, shape index: {}]   ;;  %s954_s3 = inlined_call_operand.vmem [shape: f32[2,3,2048], index: 3, kind: output, shape index: {}]  }
   0x1   :  { %s712_s14 = smov 0  }
   0x2 LB: > { %s22_s15 = sadd.s32 1, %s682_s13  ;;  %p599_p0 = scmp.ge.s32.totalorder %s686_s14, 1  ;;  %s686_s14 = sphi %s712_s14, %s13_s14   ;;  %s682_s13 = sphi %s710_s13, %s962_s13   ;;  %s678_s12 = sphi %s708_s12, %s961_s12  }
   0x3   : > { %p23_p1 = scmp.ge.s32.totalorder %s22_s15, 2  ;;  %p179_p2 = scmp.lt.s32.totalorder %s686_s14, 3 }
   0x5   : > { %s964_s15 = smov (%p23_p1, %s22_s15), 0  ;;  %p180_p3 = pnand %p599_p0, %p179_p2 }
   0x6   : > { %p232_p4 = scmp.lt.s32.totalorder (!%p180_p3), %s678_s12, 1  ;;  %v729_v0 = vld [vmem:[%s952_s1] sm:$0x77] (!%p180_p3)  ;;  %v736_v1 = vld [vmem:[%s952_s1 + $0x8] sm:$0x77] (!%p180_p3)  ;;  %v383_v43 = vlaneseq (!%p180_p3) }
   0x7   : > { %183 = sbr.rel (%p180_p3) target bundleno = 73 (0x49), region = 32  ;;  %v741_v2 = vld [vmem:[%s952_s1 + $0x10] sm:$0x77] (!%p180_p3)  ;;  %vm269_vm0 = vcmp.lt.f32.partialorder (!%p180_p3), %v729_v0, 0.0  ;;  %vm270_vm1 = vcmp.lt.f32.partialorder (!%p180_p3), %v736_v1, 0.0  ;;  %v267_v62 = vld [vmem:[%s951_s0] sm:$0xff] (!%p180_p3) }
   0x8   : > { %vm271_vm2 = vcmp.lt.f32.partialorder (!%p180_p3), %v741_v2, 0.0  ;;  %v757_v3 = vld [vmem:[%s952_s1 + $0x18] sm:$0x77] (!%p180_p3)  ;;  %v767_v12 = vld [vmem:[%s952_s1 + $0x20] sm:$0x77] (!%p180_p3)  ;;  %v822_v52 = vshrl.u32 (!%p180_p3), %v383_v43, 7 }
   0x9   : > { %vm272_vm3 = vcmp.lt.f32.partialorder (!%p180_p3), %v757_v3, 0.0  ;;  %v779_v17 = vld [vmem:[%s952_s1 + $0x28] sm:$0x77] (!%p180_p3)  ;;  %vm273_vm4 = vcmp.lt.f32.partialorder (!%p180_p3), %v767_v12, 0.0  ;;  %v789_v25 = vld [vmem:[%s952_s1 + $0x30] sm:$0x77] (!%p180_p3) }
   0xa   : > { %vm274_vm5 = vcmp.lt.f32.partialorder (!%p180_p3), %v779_v17, 0.0  ;;  %v797_v30 = vld [vmem:[%s952_s1 + $0x38] sm:$0x77] (!%p180_p3)  ;;  %vm275_vm6 = vcmp.lt.f32.partialorder (!%p180_p3), %v789_v25, 0.0  ;;  %v385_v59 = vsub.s32 (!%p180_p3), 0, %v822_v52  ;;  %v389_v60 = vsub.s32 (!%p180_p3), 1, %v822_v52 }
   0xb   : > { %vm276_vm7 = vcmp.lt.f32.partialorder (!%p180_p3), %v797_v30, 0.0  ;;  %v393_v63 = vsub.s32 (!%p180_p3), 2, %v822_v52 }
   0xe   : > { %s966_s12 = smov (!%p232_p4, %s678_s12), 1 }
   0xf   : > { %s606_s22 = sshll.u32 %s966_s12, 6 }
  0x10   : > { %s749_s25 = scalar_lea.vmem %s953_s2, %s606_s22  ;;  %s893_s19 = scalar_lea.vmem %s954_s3, %s606_s22 }
  0x11   : > { %v251_v4 = vld [vmem:[%s749_s25] sm:$0x77]  ;;  %v252_v5 = vld [vmem:[%s749_s25 + $0x8] sm:$0x77]  ;;  %v253_v6 = vld [vmem:[%s749_s25 + $0x10] sm:$0x77] }
  0x12   : > { %v285_v7 = vsub.f32 0.0, %v251_v4  ;;  %v286_v8 = vsub.f32 0.0, %v252_v5  ;;  %v287_v9 = vsub.f32 0.0, %v253_v6  ;;  %v254_v10 = vld [vmem:[%s749_s25 + $0x18] sm:$0x77] }
  0x13   : > { %v288_v11 = vsub.f32 0.0, %v254_v10  ;;  %v255_v16 = vld [vmem:[%s749_s25 + $0x20] sm:$0x77]  ;;  %v256_v22 = vld [vmem:[%s749_s25 + $0x28] sm:$0x77] }
  0x14   : > { %v293_v13 = vsel %vm269_vm0, %v251_v4, %v285_v7  ;;  %v294_v14 = vsel %vm270_vm1, %v252_v5, %v286_v8  ;;  %v295_v15 = vsel %vm271_vm2, %v253_v6, %v287_v9  ;;  %v289_v24 = vsub.f32 0.0, %v255_v16  ;;  %v257_v28 = vld [vmem:[%s749_s25 + $0x30] sm:$0x77]  ;;  %v258_v32 = vld [vmem:[%s749_s25 + $0x38] sm:$0x77] }
  0x15   : > { %v301_v18 = vmul.f32 1.442695, %v293_v13  ;;  %v303_v19 = vmul.f32 1.442695, %v294_v14  ;;  %v305_v20 = vmul.f32 1.442695, %v295_v15  ;;  %v296_v21 = vsel %vm272_vm3, %v254_v10, %v288_v11 }
  0x16   : > { %v307_v23 = vmul.f32 1.442695, %v296_v21  ;;  %v297_v26 = vsel %vm273_vm4, %v255_v16, %v289_v24  ;;  %v290_v27 = vsub.f32 0.0, %v256_v22  ;;  %v291_v34 = vsub.f32 0.0, %v257_v28 }
  0x17   : > { %632 = vpow2.f32 %v301_v18  ;;  %v309_v29 = vmul.f32 1.442695, %v297_v26  ;;  %v292_v36 = vsub.f32 0.0, %v258_v32  ;;  %v397_v4 = vsub.s32 3, %v822_v52  ;;  %v866_v26 = vld [vmem:[%s951_s0 + $0x8] sm:$0xff] }
  0x18   : > { %634 = vpow2.f32 %v303_v19  ;;  %v298_v31 = vsel %vm274_vm5, %v256_v22, %v290_v27  ;;  %v299_v35 = vsel %vm275_vm6, %v257_v28, %v291_v34  ;;  %v401_v6 = vsub.s32 4, %v822_v52 }
  0x19   : > { %636 = vpow2.f32 %v305_v20  ;;  %v311_v33 = vmul.f32 1.442695, %v298_v31  ;;  %v313_v37 = vmul.f32 1.442695, %v299_v35  ;;  %v300_v38 = vsel %vm276_vm7, %v258_v32, %v292_v36 }
  0x1a   : > { %638 = vpow2.f32 %v307_v23  ;;  %v315_v40 = vmul.f32 1.442695, %v300_v38  ;;  %v405_v7 = vsub.s32 5, %v822_v52  ;;  %v956_v10 = vsub.s32 6, %v822_v52 }
  0x1b   : > { %640 = vpow2.f32 %v309_v29  ;;  %v955_v11 = vsub.s32 7, %v822_v52  ;;  %v386_v13 = vrot.slane %v267_v62, %v385_v59  ;;  %v390_v14 = vrot.slane %v267_v62, %v389_v60 }
  0x1c   : > { %642 = vpow2.f32 %v311_v33  ;;  %v277_v18 = vand.u32 2147483647, %v729_v0  ;;  %v278_v19 = vand.u32 2147483647, %v736_v1  ;;  %v394_v20 = vrot.slane %v267_v62, %v393_v63 }
  0x1d   : > { %644 = vpow2.f32 %v313_v37  ;;  %v398_v21 = vrot.slane %v267_v62, %v397_v4  ;;  %v402_v23 = vrot.slane %v267_v62, %v401_v6  ;;  %v406_v24 = vrot.slane %v267_v62, %v405_v7 }
  0x1e   : > { %646 = vpow2.f32 %v315_v40  ;;  %v279_v31 = vand.u32 2147483647, %v741_v2  ;;  %v410_v32 = vrot.slane %v267_v62, %v956_v10  ;;  %v414_v33 = vrot.slane %v267_v62, %v955_v11 }
  0x1f   : > { %v447_v35 = vcombine.low %v386_v13, %v390_v14  ;;  %v280_v37 = vand.u32 2147483647, %v757_v3  ;;  %v418_v43 = vrot.slane %v866_v26, %v385_v59  ;;  %v281_v14 = vand.u32 2147483647, %v767_v12 }
  0x20   : > { %v430_v1 = vrot.slane %v866_v26, %v397_v4  ;;  %v438_v3 = vrot.slane %v866_v26, %v405_v7 }
  0x21   : > { %v808_v39 = vpop.eup %632 }
  0x22   : > { %v810_v41 = vpop.eup %634  ;;  %v317_v42 = vadd.f32 1.0, %v808_v39 }
  0x23   : > { %v813_v44 = vpop.eup %636  ;;  %v318_v45 = vadd.f32 1.0, %v810_v41 }
  0x24   : > { %v816_v46 = vpop.eup %638  ;;  %v325_v47 = vmin.f32 %v317_v42, 1e+30  ;;  %v319_v48 = vadd.f32 1.0, %v813_v44 }
  0x25   : > { %v326_v49 = vmin.f32 %v318_v45, 1e+30  ;;  %v320_v50 = vadd.f32 1.0, %v816_v46  ;;  %v820_v51 = vpop.eup %640  ;;  %v422_v45 = vrot.slane %v866_v26, %v389_v60 }
  0x26   : > { %648 = vrcp.f32 %v325_v47  ;;  %v327_v53 = vmin.f32 %v319_v48, 1e+30  ;;  %v321_v55 = vadd.f32 1.0, %v820_v51  ;;  %v825_v56 = vpop.eup %642  ;;  %v448_v48 = vcombine.low %v394_v20, %v398_v21 }
  0x27   : > { %650 = vrcp.f32 %v326_v49  ;;  %v328_v54 = vmin.f32 %v320_v50, 1e+30  ;;  %v828_v58 = vadd.f32 1.0, %v825_v56  ;;  %v832_v61 = vpop.eup %644  ;;  %v449_v50 = vcombine.low %v402_v23, %v406_v24 }
  0x28   : > { %652 = vrcp.f32 %v327_v53  ;;  %v329_v57 = vmin.f32 %v321_v55, 1e+30  ;;  %v843_v8 = vadd.f32 1.0, %v832_v61  ;;  %v845_v9 = vpop.eup %646  ;;  %v451_v20 = vcombine.low %v418_v43, %v422_v45 }
  0x29   : > { %654 = vrcp.f32 %v328_v54  ;;  %v330_v5 = vmin.f32 %v828_v58, 1e+30  ;;  %v853_v16 = vadd.f32 1.0, %v845_v9 }
  0x2a   : > { %656 = vrcp.f32 %v329_v57  ;;  %v331_v15 = vmin.f32 %v843_v8, 1e+30 }
  0x2b   : > { %658 = vrcp.f32 %v330_v5  ;;  %v957_v27 = vmin.f32 %v853_v16, 1e+30  ;;  %v958_v12 = vmin.f32 %v853_v16, 1e+30 }
  0x2c   : > { %660 = vrcp.f32 %v331_v15 }
  0x2d   : > { %662 = vrcp.f32 %v957_v27 }
  0x30   : > { %v649_v22 = vpop.eup %648 }
  0x31   : > { %v651_v28 = vpop.eup %650  ;;  %v341_v29 = vmul.f32 %v649_v22, %v325_v47 }
  0x32   : > { %v653_v34 = vpop.eup %652  ;;  %v342_v36 = vmul.f32 %v651_v28, %v326_v49  ;;  %v450_v49 = vcombine.low %v410_v32, %v414_v33 }
  0x33   : > { %v655_v38 = vpop.eup %654  ;;  %v349_v40 = vsub.f32 2.0, %v341_v29  ;;  %v343_v42 = vmul.f32 %v653_v34, %v327_v53  ;;  %v282_v53 = vand.u32 2147483647, %v779_v17 }
  0x34   : > { %v350_v47 = vsub.f32 2.0, %v342_v36  ;;  %v344_v55 = vmul.f32 %v655_v38, %v328_v54  ;;  %v657_v62 = vpop.eup %656  ;;  %v426_v54 = vrot.slane %v866_v26, %v393_v63 }
  0x35   : > { %v357_v8 = vmul.f32 %v649_v22, %v349_v40  ;;  %v351_v13 = vsub.f32 2.0, %v343_v42  ;;  %v345_v27 = vmul.f32 %v657_v62, %v329_v57  ;;  %v659_v29 = vpop.eup %658 }
  0x36   : > { %v358_v11 = vmul.f32 %v651_v28, %v350_v47  ;;  %v352_v10 = vsub.f32 2.0, %v344_v55  ;;  %v346_v57 = vmul.f32 %v659_v29, %v330_v5  ;;  %v434_v28 = vrot.slane %v866_v26, %v401_v6 }
  0x37   : > { %v365_v59 = vsel %vm269_vm0, %v808_v39, %v357_v8  ;;  %v359_v60 = vmul.f32 %v653_v34, %v351_v13  ;;  %v353_v24 = vsub.f32 2.0, %v345_v27  ;;  %v452_v33 = vcombine.low %v426_v54, %v430_v1 }
  0x38   : > { %v373_v21 = vmul.f32 %v365_v59, %v277_v18  ;;  %v366_v22 = vsel %vm270_vm1, %v810_v41, %v358_v11  ;;  %v360_v23 = vmul.f32 %v655_v38, %v352_v10  ;;  %v661_v41 = vpop.eup %660  ;;  %v283_v34 = vand.u32 2147483647, %v789_v25 }
  0x39   : > { %v374_v0 = vmul.f32 %v366_v22, %v278_v19  ;;  %v367_v39 = vsel %vm271_vm2, %v813_v44, %v359_v60  ;;  %v361_v18 = vmul.f32 %v657_v62, %v353_v24  ;;  %v354_v44 = vsub.f32 2.0, %v346_v57  ;;  %v663_v58 = vpop.eup %662 }
  0x3a   : > { %v463_v63 = vadd.f32 %v447_v35, %v373_v21  ;;  %v375_v10 = vmul.f32 %v367_v39, %v279_v31  ;;  %v368_v11 = vsel %vm272_vm3, %v816_v46, %v360_v23  ;;  %v347_v27 = vmul.f32 %v661_v41, %v331_v15 }
  0x3b   : > { %v464_v19 = vadd.f32 %v448_v48, %v374_v0  ;;  %v376_v2 = vmul.f32 %v368_v11, %v280_v37  ;;  %v369_v4 = vsel %vm273_vm4, %v820_v51, %v361_v18  ;;  %v362_v15 = vmul.f32 %v659_v29, %v354_v44 }
  0x3c   : > { %471 = vst [vmem:[%s893_s19] sm:$0x77] %v463_v63  ;;  %v465_v5 = vadd.f32 %v449_v50, %v375_v10  ;;  %v377_v31 = vmul.f32 %v369_v4, %v281_v14  ;;  %v355_v32 = vsub.f32 2.0, %v347_v27  ;;  %v348_v51 = vmul.f32 %v663_v58, %v958_v12 }
  0x3d   : > { %472 = vst [vmem:[%s893_s19 + $0x8] sm:$0x77] %v464_v19  ;;  %v466_v46 = vadd.f32 %v450_v49, %v376_v2  ;;  %v959_v35 = vsub.s32 6, %v822_v52  ;;  %v370_v36 = vsel %vm274_vm5, %v825_v56, %v362_v15  ;;  %v960_v38 = vsub.s32 7, %v822_v52 }
  0x3e   : > { %473 = vst [vmem:[%s893_s19 + $0x10] sm:$0x77] %v465_v5  ;;  %v467_v7 = vadd.f32 %v451_v20, %v377_v31  ;;  %v363_v37 = vmul.f32 %v661_v41, %v355_v32  ;;  %v378_v42 = vmul.f32 %v370_v36, %v282_v53  ;;  %v453_v16 = vcombine.low %v434_v28, %v438_v3 }
  0x3f   : > { %v442_v6 = vrot.slane %v866_v26, %v959_v35  ;;  %474 = vst [vmem:[%s893_s19 + $0x18] sm:$0x77] %v466_v46  ;;  %v446_v40 = vrot.slane %v866_v26, %v960_v38  ;;  %v356_v43 = vsub.f32 2.0, %v348_v51  ;;  %v284_v47 = vand.u32 2147483647, %v797_v30 }
  0x40   : > { %475 = vst [vmem:[%s893_s19 + $0x20] sm:$0x77] %v467_v7  ;;  %v371_v45 = vsel %vm275_vm6, %v832_v61, %v363_v37  ;;  %v468_v48 = vadd.f32 %v452_v33, %v378_v42 }
  0x41   : > { %v379_v17 = vmul.f32 %v371_v45, %v283_v34  ;;  %v364_v56 = vmul.f32 %v663_v58, %v356_v43  ;;  %v454_v50 = vcombine.low %v442_v6, %v446_v40 }
  0x42   : > { %476 = vst [vmem:[%s893_s19 + $0x28] sm:$0x77] %v468_v48 }
  0x43   : > { %v469_v52 = vadd.f32 %v453_v16, %v379_v17  ;;  %v372_v26 = vsel %vm276_vm7, %v845_v9, %v364_v56 }
  0x44   : > { %v380_v55 = vmul.f32 %v372_v26, %v284_v47 }
  0x45   : > { %477 = vst [vmem:[%s893_s19 + $0x30] sm:$0x77] %v469_v52 }
  0x46   : > { %v470_v62 = vadd.f32 %v454_v50, %v380_v55 }
  0x48   : > { %478 = vst [vmem:[%s893_s19 + $0x38] sm:$0x77] %v470_v62 }
  0x49 PF: > { %s13_s14 = sadd.s32 1, %s686_s14   ;;  %s961_s12 = smov %s682_s13 }
  0x4a   : > { %p10_p5 = scmp.ge.s32.totalorder %s13_s14, 4   ;;  %s962_s13 = smov %s964_s15 }
  0x4c   :  { %12 = sbr.rel (!%p10_p5) target bundleno = 2 (0x2), region = 68 }

</bundles_post_ra>
